<compile_context>
chip_gen: v6e
topology: v6e:2x2x1
jax: 0.10.0
libtpu: 0.0.40
codegen_flags: <defaults>
</compile_context>

<pallas_src>
import functools

import numpy as np
import jax
import jax.numpy as jnp
from jax.experimental import pallas as pl
from jax.experimental.pallas import tpu as pltpu


def _round_up(a, b):
    return -(-a // b) * b


# ---------------------------------------------------------------------------
# Kernel 1: conv as one K = kh*kw*C_pad MXU matmul + fused BN partial statistics
#           + fused crop / H-stride subsample into a compact per-row layout.
# ---------------------------------------------------------------------------
def _conv_bn_stats_kernel(x_ref, w_ref, mask_ref,
                          o_ref, sum_ref, sumsq_ref, win_ref,
                          *, kh, kw, Wp, L_pad, C_pad, Ho, Wo_span, stride):
    # x_ref:    (1, C_pad, P_pad)       flattened zero-padded image (compute dtype)
    # w_ref:    (Co, kh*kw*C_pad)       weights, K ordered (tap-major, channel-minor)
    # mask_ref: (1, L_pad)              1.0 on valid (stride-subsampled) output positions
    # o_ref:    (1, Co, Ho*Wo_span)     conv output, junk columns already dropped
    # sum_ref / sumsq_ref: (1, Co, 1)   per-image BN partial statistics (f32)
    # win_ref:  (kh*kw*C_pad, L_pad)    VMEM scratch: stacked shifted windows
    x = x_ref[0]                                          # (C_pad, P_pad), one VMEM load

    # Stack the kh*kw shifted flat windows -> a single deep-K matmul instead of
    # kh*kw shallow (K=C) matmuls plus VPU accumulate adds.
    # TODO(synk): share the kh row-base windows and derive the kw lane shifts with
    # pltpu.roll to cut the per-tap lane realignment work ~3x.
    for dh in range(kh):
        for dw in range(kw):
            k = dh * kw + dw
            off = dh * Wp + dw                            # static shift of the flat window
            win_ref[k * C_pad:(k + 1) * C_pad, :] = x[:, off:off + L_pad]

    acc = jnp.dot(w_ref[...], win_ref[...],
                  preferred_element_type=jnp.float32)     # (Co, L_pad), f32 accumulation

    # Fused BN batch-stat partials over valid output positions only.
    # mask is 0/1, so am*acc == acc*acc*mask (saves one full-tile multiply).
    am = acc * mask_ref[...]
    sum_ref[0] = jnp.sum(am, axis=1, keepdims=True)       # (Co, 1)
    sumsq_ref[0] = jnp.sum(am * acc, axis=1, keepdims=True)

    # Crop + H-stride subsample fused here: write each output row straight into the
    # compact layout (no extra HBM pass over a dense (Co, L_pad) buffer afterwards).
    for h in range(Ho):
        start = h * stride * Wp
        o_ref[0, :, h * Wo_span:(h + 1) * Wo_span] = (
            acc[:, start:start + Wo_span].astype(o_ref.dtype))


# ---------------------------------------------------------------------------
# Kernel 2: apply BN (precomputed per-channel scale/shift) + ReLU, elementwise.
# ---------------------------------------------------------------------------
def _bn_relu_kernel(x_ref, scale_ref, shift_ref, o_ref):
    # x_ref: (1, Co, Ho*Wo_span), scale/shift: (Co, 1), o_ref: (1, Co, Ho*Wo_span)
    y = x_ref[0].astype(jnp.float32) * scale_ref[...] + shift_ref[...]
    o_ref[0] = jnp.maximum(y, 0.0).astype(o_ref.dtype)


# ---------------------------------------------------------------------------
# Wrapper: one pad + free reshape, two pallas_calls, tiny stat reduction
# ---------------------------------------------------------------------------
def conv2d_bn_relu(x, weight, bias, gamma, beta, *, stride, padding,
                   eps=1e-5, compute_dtype=jnp.bfloat16):
    """Conv2d(inplanes, planes, 3, stride, padding) -> BatchNorm2d(train) -> ReLU.

    x:      (N, C, H, W)  NCHW
    weight: (Co, C, 3, 3)
    bias:   (Co,)   -- accepted for API parity; cancels under training-mode BN
    gamma:  (Co,)   BN affine weight
    beta:   (Co,)   BN affine bias
    returns (N, Co, Ho, Wo)  NCHW, dtype of x
    """
    del bias  # per-channel constant bias cancels exactly after BN mean subtraction

    N, C, H, W = x.shape
    Co, Ci, kh, kw = weight.shape
    assert Ci == C
    out_dtype = x.dtype

    C_pad = _round_up(C, 8)                       # sublane-aligned tap stacking
    Hp, Wp = H + 2 * padding, W + 2 * padding
    Ho = (Hp - kh) // stride + 1
    Wo = (Wp - kw) // stride + 1
    Wo_span = (Wo - 1) * stride + 1               # dense width covering the strided cols
    HoWs = Ho * Wo_span

    # Dense-row flat-window conv bookkeeping (H-stride is folded at the row crop).
    Ho_d = Hp - kh + 1
    L = Ho_d * Wp
    L_pad = _round_up(L, 128)                     # lane width of the matmul RHS
    max_off = (kh - 1) * Wp + (kw - 1)
    rows_ext = -(-(L_pad + max_off) // Wp)        # rows so every tap window is in bounds
    P_pad = rows_ext * Wp

    # ---- glue: a single pad (channel pad + spatial zero-pad + extra bottom rows),
    #      then a free row-major flatten of the spatial dims. ----
    # TODO(synk): move the zero-pad into the kernel (pre-zeroed VMEM scratch + manual
    # DMA of the unpadded image) to drop this remaining host-side pass.
    xf = jnp.pad(x.astype(compute_dtype),
                 ((0, 0), (0, C_pad - C),
                  (padding, rows_ext - H - padding),
                  (padding, padding))).reshape(N, C_pad, P_pad)

    # weights -> (Co, K) with K ordered (tap-major, channel-minor) to match win_ref.
    K = kh * kw * C_pad
    wt = jnp.transpose(weight, (2, 3, 1, 0))                     # (kh, kw, C, Co)
    wt = jnp.pad(wt, ((0, 0), (0, 0), (0, C_pad - C), (0, 0)))   # (kh, kw, C_pad, Co)
    w2d = wt.reshape(K, Co).T.astype(compute_dtype)              # (Co, K)

    # validity mask over the flat dense output (host-side; no in-kernel div/mod)
    j = np.arange(L_pad)
    hd, wd = j // Wp, j % Wp
    valid = ((j < L) & (hd % stride == 0) & (hd // stride < Ho)
             & (wd % stride == 0) & (wd // stride < Wo))
    mask = jnp.asarray(valid, dtype=jnp.float32).reshape(1, L_pad)

    flops = 2 * N * Co * K * L_pad
    bytes_accessed = int(
        int(xf.size) * xf.dtype.itemsize + int(w2d.size) * w2d.dtype.itemsize
        + L_pad * 4 + N * Co * HoWs * xf.dtype.itemsize + 2 * N * Co * 4)

    # ---- Pallas kernel 1: conv + fused stats + fused crop (grid over batch) ----
    # TODO(synk): for very large images, tile Ho with a (kh-1)-row halo as a second
    # "parallel" grid axis so the per-step block fits v7x's 64 MiB VMEM.
    conv_i, psum, psumsq = pl.pallas_call(
        functools.partial(_conv_bn_stats_kernel, kh=kh, kw=kw, Wp=Wp, L_pad=L_pad,
                          C_pad=C_pad, Ho=Ho, Wo_span=Wo_span, stride=stride),
        out_shape=(
            jax.ShapeDtypeStruct((N, Co, HoWs), compute_dtype),  # compact conv output
            jax.ShapeDtypeStruct((N, Co, 1), jnp.float32),       # per-image sum
            jax.ShapeDtypeStruct((N, Co, 1), jnp.float32),       # per-image sum of sq.
        ),
        grid=(N,),
        in_specs=[
            pl.BlockSpec((1, C_pad, P_pad), lambda n: (n, 0, 0)),
            pl.BlockSpec((Co, K), lambda n: (0, 0)),
            pl.BlockSpec((1, L_pad), lambda n: (0, 0)),
        ],
        out_specs=(
            pl.BlockSpec((1, Co, HoWs), lambda n: (n, 0, 0)),
            pl.BlockSpec((1, Co, 1), lambda n: (n, 0, 0)),
            pl.BlockSpec((1, Co, 1), lambda n: (n, 0, 0)),
        ),
        scratch_shapes=[pltpu.VMEM((K, L_pad), compute_dtype)],
        compiler_params=pltpu.CompilerParams(
            dimension_semantics=("parallel",),
            vmem_limit_bytes=32 * 1024 * 1024),
        cost_estimate=pl.CostEstimate(flops=flops, transcendentals=0,
                                      bytes_accessed=bytes_accessed),
    )(xf, w2d, mask)

    # ---- tiny (Co-sized) reduction in JAX: combine partials -> scale/shift ----
    m_total = jnp.float32(N * Ho * Wo)
    mean = jnp.sum(psum[:, :, 0], axis=0) / m_total               # (Co,)
    ex2 = jnp.sum(psumsq[:, :, 0], axis=0) / m_total
    var = jnp.maximum(ex2 - mean * mean, 0.0)                     # biased var (BN fwd)
    inv_std = jax.lax.rsqrt(var + eps)
    g32 = gamma.astype(jnp.float32)
    scale = (g32 * inv_std).reshape(Co, 1)
    shift = (beta.astype(jnp.float32) - mean * g32 * inv_std).reshape(Co, 1)

    # ---- Pallas kernel 2: BN apply + ReLU on the already-compacted buffer ----
    bn = pl.pallas_call(
        _bn_relu_kernel,
        out_shape=jax.ShapeDtypeStruct((N, Co, HoWs), out_dtype),
        grid=(N,),
        in_specs=[
            pl.BlockSpec((1, Co, HoWs), lambda n: (n, 0, 0)),
            pl.BlockSpec((Co, 1), lambda n: (0, 0)),
            pl.BlockSpec((Co, 1), lambda n: (0, 0)),
        ],
        out_specs=pl.BlockSpec((1, Co, HoWs), lambda n: (n, 0, 0)),
        compiler_params=pltpu.CompilerParams(
            dimension_semantics=("parallel",),
            vmem_limit_bytes=32 * 1024 * 1024),
    )(conv_i, scale, shift)

    # Free row-major split of the last dim; for stride==1 this IS the final output.
    out = bn.reshape(N, Co, Ho, Wo_span)
    if stride == 1:
        return out
    # TODO(synk): fold the W-stride subsample into kernel 1's row crop for strided
    # configs; for now it is one strided slice over the already H-cropped buffer.
    return out[:, :, :, ::stride]


# ---------------------------------------------------------------------------
# Pure-JAX reference (for correctness check)
# ---------------------------------------------------------------------------
def _reference(x, weight, bias, gamma, beta, *, stride, padding, eps=1e-5):
    conv = jax.lax.conv_general_dilated(
        x.astype(jnp.float32), weight.astype(jnp.float32),
        window_strides=(stride, stride),
        padding=[(padding, padding), (padding, padding)],
        dimension_numbers=("NCHW", "OIHW", "NCHW"),
    ) + bias.reshape(1, -1, 1, 1)
    mean = jnp.mean(conv, axis=(0, 2, 3), keepdims=True)
    var = jnp.mean((conv - mean) ** 2, axis=(0, 2, 3), keepdims=True)
    y = (conv - mean) * jax.lax.rsqrt(var + eps)
    y = y * gamma.reshape(1, -1, 1, 1) + beta.reshape(1, -1, 1, 1)
    return jnp.maximum(y, 0.0)


if __name__ == "__main__":
    # Module config: Conv2d(inplanes=4, planes=8, stride=1, padding=1)
    N, C, H, W = 2, 4, 16, 16
    Co, stride, padding = 8, 1, 1

    key = jax.random.PRNGKey(0)
    kx, kw_, kb, kg, kbt = jax.random.split(key, 5)
    x = jax.random.normal(kx, (N, C, H, W), dtype=jnp.float32)
    weight = 0.1 * jax.random.normal(kw_, (Co, C, 3, 3), dtype=jnp.float32)
    bias = 0.1 * jax.random.normal(kb, (Co,), dtype=jnp.float32)
    gamma = 1.0 + 0.1 * jax.random.normal(kg, (Co,), dtype=jnp.float32)
    beta = 0.1 * jax.random.normal(kbt, (Co,), dtype=jnp.float32)

    ref = _reference(x, weight, bias, gamma, beta, stride=stride, padding=padding)

    # f32 MXU path: strict parity with the reference.
    fn_f32 = jax.jit(functools.partial(conv2d_bn_relu, stride=stride, padding=padding,
                                       compute_dtype=jnp.float32))
    out = jax.block_until_ready(fn_f32(x, weight, bias, gamma, beta))
    assert out.shape == (N, Co, H, W), out.shape
    assert jnp.allclose(out, ref, atol=1e-4, rtol=1e-4), \
        f"f32 max err {jnp.max(jnp.abs(out - ref))}"

    # bf16 MXU-input path (default): f32 accumulation + f32 BN statistics.
    fn_bf16 = jax.jit(functools.partial(conv2d_bn_relu, stride=stride, padding=padding,
                                        compute_dtype=jnp.bfloat16))
    out_bf16 = jax.block_until_ready(fn_bf16(x, weight, bias, gamma, beta))
    assert out_bf16.shape == (N, Co, H, W), out_bf16.shape
    assert jnp.allclose(out_bf16, ref, atol=5e-2, rtol=5e-2), \
        f"bf16 max err {jnp.max(jnp.abs(out_bf16 - ref))}"

    print("KERNEL_OK")
</pallas_src>

<mosaic_0001>
module attributes {stable_mosaic.version = 11 : i64} {
  func.func @_conv_bn_stats_kernel(%arg0: i32, %arg1: memref<1x8x432xf32, #tpu.memory_space<vmem>>, %arg2: memref<8x72xf32, #tpu.memory_space<vmem>>, %arg3: memref<1x384xf32, #tpu.memory_space<vmem>>, %arg4: memref<1x8x256xf32, #tpu.memory_space<vmem>>, %arg5: memref<1x8x1xf32, #tpu.memory_space<vmem>>, %arg6: memref<1x8x1xf32, #tpu.memory_space<vmem>>, %arg7: memref<72x384xf32, #tpu.memory_space<vmem>>) attributes {dimension_semantics = [#tpu.dimension_semantics<parallel>], iteration_bounds = array<i64: 2>, scalar_prefetch = 0 : i64, scratch_operands = 1 : i64, tpu.core_type = #tpu.core_type<tc>, window_params = [{transform_indices = @transform_0, window_bounds = array<i64: 1, 8, 432>}, {pipeline_mode = #tpu.pipeline_mode<synchronous>, transform_indices = @transform_1, window_bounds = array<i64: 8, 72>}, {pipeline_mode = #tpu.pipeline_mode<synchronous>, transform_indices = @transform_2, window_bounds = array<i64: 1, 384>}, {transform_indices = @transform_3, window_bounds = array<i64: 1, 8, 256>}, {transform_indices = @transform_4, window_bounds = array<i64: 1, 8, 1>}, {transform_indices = @transform_5, window_bounds = array<i64: 1, 8, 1>}]} {
    %c0 = arith.constant 0 : index
    %c0_0 = arith.constant 0 : index
    %c0_1 = arith.constant 0 : index
    %0 = vector.load %arg1[%c0, %c0_0, %c0_1] : memref<1x8x432xf32, #tpu.memory_space<vmem>>, vector<1x8x432xf32>
    %1 = vector.shape_cast %0 : vector<1x8x432xf32> to vector<8x432xf32>
    %2 = vector.extract_strided_slice %1 {offsets = [0, 0], sizes = [8, 384], strides = [1, 1]} : vector<8x432xf32> to vector<8x384xf32>
    %c0_2 = arith.constant 0 : index
    %c0_3 = arith.constant 0 : index
    %3 = vector.load %arg7[%c0_2, %c0_3] : memref<72x384xf32, #tpu.memory_space<vmem>>, vector<8x384xf32>
    tpu.vector_store %arg7[%c0_2, %c0_3], %2 {strides = array<i32>} : memref<72x384xf32, #tpu.memory_space<vmem>>, vector<8x384xf32>,
    %4 = vector.extract_strided_slice %1 {offsets = [0, 1], sizes = [8, 384], strides = [1, 1]} : vector<8x432xf32> to vector<8x384xf32>
    %c8 = arith.constant 8 : index
    %c0_4 = arith.constant 0 : index
    %5 = vector.load %arg7[%c8, %c0_4] : memref<72x384xf32, #tpu.memory_space<vmem>>, vector<8x384xf32>
    tpu.vector_store %arg7[%c8, %c0_4], %4 {strides = array<i32>} : memref<72x384xf32, #tpu.memory_space<vmem>>, vector<8x384xf32>,
    %6 = vector.extract_strided_slice %1 {offsets = [0, 2], sizes = [8, 384], strides = [1, 1]} : vector<8x432xf32> to vector<8x384xf32>
    %c16 = arith.constant 16 : index
    %c0_5 = arith.constant 0 : index
    %7 = vector.load %arg7[%c16, %c0_5] : memref<72x384xf32, #tpu.memory_space<vmem>>, vector<8x384xf32>
    tpu.vector_store %arg7[%c16, %c0_5], %6 {strides = array<i32>} : memref<72x384xf32, #tpu.memory_space<vmem>>, vector<8x384xf32>,
    %8 = vector.extract_strided_slice %1 {offsets = [0, 18], sizes = [8, 384], strides = [1, 1]} : vector<8x432xf32> to vector<8x384xf32>
    %c24 = arith.constant 24 : index
    %c0_6 = arith.constant 0 : index
    %9 = vector.load %arg7[%c24, %c0_6] : memref<72x384xf32, #tpu.memory_space<vmem>>, vector<8x384xf32>
    tpu.vector_store %arg7[%c24, %c0_6], %8 {strides = array<i32>} : memref<72x384xf32, #tpu.memory_space<vmem>>, vector<8x384xf32>,
    %10 = vector.extract_strided_slice %1 {offsets = [0, 19], sizes = [8, 384], strides = [1, 1]} : vector<8x432xf32> to vector<8x384xf32>
    %c32 = arith.constant 32 : index
    %c0_7 = arith.constant 0 : index
    %11 = vector.load %arg7[%c32, %c0_7] : memref<72x384xf32, #tpu.memory_space<vmem>>, vector<8x384xf32>
    tpu.vector_store %arg7[%c32, %c0_7], %10 {strides = array<i32>} : memref<72x384xf32, #tpu.memory_space<vmem>>, vector<8x384xf32>,
    %12 = vector.extract_strided_slice %1 {offsets = [0, 20], sizes = [8, 384], strides = [1, 1]} : vector<8x432xf32> to vector<8x384xf32>
    %c40 = arith.constant 40 : index
    %c0_8 = arith.constant 0 : index
    %13 = vector.load %arg7[%c40, %c0_8] : memref<72x384xf32, #tpu.memory_space<vmem>>, vector<8x384xf32>
    tpu.vector_store %arg7[%c40, %c0_8], %12 {strides = array<i32>} : memref<72x384xf32, #tpu.memory_space<vmem>>, vector<8x384xf32>,
    %14 = vector.extract_strided_slice %1 {offsets = [0, 36], sizes = [8, 384], strides = [1, 1]} : vector<8x432xf32> to vector<8x384xf32>
    %c48 = arith.constant 48 : index
    %c0_9 = arith.constant 0 : index
    %15 = vector.load %arg7[%c48, %c0_9] : memref<72x384xf32, #tpu.memory_space<vmem>>, vector<8x384xf32>
    tpu.vector_store %arg7[%c48, %c0_9], %14 {strides = array<i32>} : memref<72x384xf32, #tpu.memory_space<vmem>>, vector<8x384xf32>,
    %16 = vector.extract_strided_slice %1 {offsets = [0, 37], sizes = [8, 384], strides = [1, 1]} : vector<8x432xf32> to vector<8x384xf32>
    %c56 = arith.constant 56 : index
    %c0_10 = arith.constant 0 : index
    %17 = vector.load %arg7[%c56, %c0_10] : memref<72x384xf32, #tpu.memory_space<vmem>>, vector<8x384xf32>
    tpu.vector_store %arg7[%c56, %c0_10], %16 {strides = array<i32>} : memref<72x384xf32, #tpu.memory_space<vmem>>, vector<8x384xf32>,
    %18 = vector.extract_strided_slice %1 {offsets = [0, 38], sizes = [8, 384], strides = [1, 1]} : vector<8x432xf32> to vector<8x384xf32>
    %c64 = arith.constant 64 : index
    %c0_11 = arith.constant 0 : index
    %19 = vector.load %arg7[%c64, %c0_11] : memref<72x384xf32, #tpu.memory_space<vmem>>, vector<8x384xf32>
    tpu.vector_store %arg7[%c64, %c0_11], %18 {strides = array<i32>} : memref<72x384xf32, #tpu.memory_space<vmem>>, vector<8x384xf32>,
    %c0_12 = arith.constant 0 : index
    %c0_13 = arith.constant 0 : index
    %20 = vector.load %arg2[%c0_12, %c0_13] : memref<8x72xf32, #tpu.memory_space<vmem>>, vector<8x72xf32>
    %c0_14 = arith.constant 0 : index
    %c0_15 = arith.constant 0 : index
    %21 = vector.load %arg7[%c0_14, %c0_15] : memref<72x384xf32, #tpu.memory_space<vmem>>, vector<72x384xf32>
    %cst = arith.constant dense<0.000000e+00> : vector<8x384xf32>
    %22 = tpu.matmul %20, %21, %cst {dimension_numbers = #tpu.dot_dimension_numbers<[1], [0], [0], [1], [0, 0, 1, 1], [], []>} : vector<8x72xf32>, vector<72x384xf32>, vector<8x384xf32> -> vector<8x384xf32>
    %c0_16 = arith.constant 0 : index
    %c0_17 = arith.constant 0 : index
    %23 = vector.load %arg3[%c0_16, %c0_17] : memref<1x384xf32, #tpu.memory_space<vmem>>, vector<1x384xf32>
    %24 = vector.broadcast %23 : vector<1x384xf32> to vector<8x384xf32>
    %25 = arith.mulf %22, %24 : vector<8x384xf32>
    %cst_18 = arith.constant dense<0.000000e+00> : vector<8xf32>
    %26 = vector.multi_reduction <add>, %25, %cst_18 [1] : vector<8x384xf32> to vector<8xf32>
    %27 = vector.shape_cast %26 : vector<8xf32> to vector<8x1xf32>
    %c0_19 = arith.constant 0 : index
    %c0_20 = arith.constant 0 : index
    %c0_21 = arith.constant 0 : index
    %28 = vector.load %arg5[%c0_19, %c0_20, %c0_21] : memref<1x8x1xf32, #tpu.memory_space<vmem>>, vector<1x8x1xf32>
    %29 = vector.shape_cast %28 : vector<1x8x1xf32> to vector<8x1xf32>
    %30 = vector.shape_cast %27 : vector<8x1xf32> to vector<1x8x1xf32>
    tpu.vector_store %arg5[%c0_19, %c0_20, %c0_21], %30 {strides = array<i32>} : memref<1x8x1xf32, #tpu.memory_space<vmem>>, vector<1x8x1xf32>,
    %31 = arith.mulf %25, %22 : vector<8x384xf32>
    %cst_22 = arith.constant dense<0.000000e+00> : vector<8xf32>
    %32 = vector.multi_reduction <add>, %31, %cst_22 [1] : vector<8x384xf32> to vector<8xf32>
    %33 = vector.shape_cast %32 : vector<8xf32> to vector<8x1xf32>
    %c0_23 = arith.constant 0 : index
    %c0_24 = arith.constant 0 : index
    %c0_25 = arith.constant 0 : index
    %34 = vector.load %arg6[%c0_23, %c0_24, %c0_25] : memref<1x8x1xf32, #tpu.memory_space<vmem>>, vector<1x8x1xf32>
    %35 = vector.shape_cast %34 : vector<1x8x1xf32> to vector<8x1xf32>
    %36 = vector.shape_cast %33 : vector<8x1xf32> to vector<1x8x1xf32>
    tpu.vector_store %arg6[%c0_23, %c0_24, %c0_25], %36 {strides = array<i32>} : memref<1x8x1xf32, #tpu.memory_space<vmem>>, vector<1x8x1xf32>,
    %37 = vector.extract_strided_slice %22 {offsets = [0, 0], sizes = [8, 16], strides = [1, 1]} : vector<8x384xf32> to vector<8x16xf32>
    %c0_26 = arith.constant 0 : index
    %c0_27 = arith.constant 0 : index
    %c0_28 = arith.constant 0 : index
    %38 = vector.load %arg4[%c0_26, %c0_27, %c0_28] : memref<1x8x256xf32, #tpu.memory_space<vmem>>, vector<1x8x16xf32>
    %39 = vector.shape_cast %38 : vector<1x8x16xf32> to vector<8x16xf32>
    %40 = vector.shape_cast %37 : vector<8x16xf32> to vector<1x8x16xf32>
    tpu.vector_store %arg4[%c0_26, %c0_27, %c0_28], %40 {strides = array<i32>} : memref<1x8x256xf32, #tpu.memory_space<vmem>>, vector<1x8x16xf32>,
    %41 = vector.extract_strided_slice %22 {offsets = [0, 18], sizes = [8, 16], strides = [1, 1]} : vector<8x384xf32> to vector<8x16xf32>
    %c0_29 = arith.constant 0 : index
    %c0_30 = arith.constant 0 : index
    %c16_31 = arith.constant 16 : index
    %42 = vector.load %arg4[%c0_29, %c0_30, %c16_31] : memref<1x8x256xf32, #tpu.memory_space<vmem>>, vector<1x8x16xf32>
    %43 = vector.shape_cast %42 : vector<1x8x16xf32> to vector<8x16xf32>
    %44 = vector.shape_cast %41 : vector<8x16xf32> to vector<1x8x16xf32>
    tpu.vector_store %arg4[%c0_29, %c0_30, %c16_31], %44 {strides = array<i32>} : memref<1x8x256xf32, #tpu.memory_space<vmem>>, vector<1x8x16xf32>,
    %45 = vector.extract_strided_slice %22 {offsets = [0, 36], sizes = [8, 16], strides = [1, 1]} : vector<8x384xf32> to vector<8x16xf32>
    %c0_32 = arith.constant 0 : index
    %c0_33 = arith.constant 0 : index
    %c32_34 = arith.constant 32 : index
    %46 = vector.load %arg4[%c0_32, %c0_33, %c32_34] : memref<1x8x256xf32, #tpu.memory_space<vmem>>, vector<1x8x16xf32>
    %47 = vector.shape_cast %46 : vector<1x8x16xf32> to vector<8x16xf32>
    %48 = vector.shape_cast %45 : vector<8x16xf32> to vector<1x8x16xf32>
    tpu.vector_store %arg4[%c0_32, %c0_33, %c32_34], %48 {strides = array<i32>} : memref<1x8x256xf32, #tpu.memory_space<vmem>>, vector<1x8x16xf32>,
    %49 = vector.extract_strided_slice %22 {offsets = [0, 54], sizes = [8, 16], strides = [1, 1]} : vector<8x384xf32> to vector<8x16xf32>
    %c0_35 = arith.constant 0 : index
    %c0_36 = arith.constant 0 : index
    %c48_37 = arith.constant 48 : index
    %50 = vector.load %arg4[%c0_35, %c0_36, %c48_37] : memref<1x8x256xf32, #tpu.memory_space<vmem>>, vector<1x8x16xf32>
    %51 = vector.shape_cast %50 : vector<1x8x16xf32> to vector<8x16xf32>
    %52 = vector.shape_cast %49 : vector<8x16xf32> to vector<1x8x16xf32>
    tpu.vector_store %arg4[%c0_35, %c0_36, %c48_37], %52 {strides = array<i32>} : memref<1x8x256xf32, #tpu.memory_space<vmem>>, vector<1x8x16xf32>,
    %53 = vector.extract_strided_slice %22 {offsets = [0, 72], sizes = [8, 16], strides = [1, 1]} : vector<8x384xf32> to vector<8x16xf32>
    %c0_38 = arith.constant 0 : index
    %c0_39 = arith.constant 0 : index
    %c64_40 = arith.constant 64 : index
    %54 = vector.load %arg4[%c0_38, %c0_39, %c64_40] : memref<1x8x256xf32, #tpu.memory_space<vmem>>, vector<1x8x16xf32>
    %55 = vector.shape_cast %54 : vector<1x8x16xf32> to vector<8x16xf32>
    %56 = vector.shape_cast %53 : vector<8x16xf32> to vector<1x8x16xf32>
    tpu.vector_store %arg4[%c0_38, %c0_39, %c64_40], %56 {strides = array<i32>} : memref<1x8x256xf32, #tpu.memory_space<vmem>>, vector<1x8x16xf32>,
    %57 = vector.extract_strided_slice %22 {offsets = [0, 90], sizes = [8, 16], strides = [1, 1]} : vector<8x384xf32> to vector<8x16xf32>
    %c0_41 = arith.constant 0 : index
    %c0_42 = arith.constant 0 : index
    %c80 = arith.constant 80 : index
    %58 = vector.load %arg4[%c0_41, %c0_42, %c80] : memref<1x8x256xf32, #tpu.memory_space<vmem>>, vector<1x8x16xf32>
    %59 = vector.shape_cast %58 : vector<1x8x16xf32> to vector<8x16xf32>
    %60 = vector.shape_cast %57 : vector<8x16xf32> to vector<1x8x16xf32>
    tpu.vector_store %arg4[%c0_41, %c0_42, %c80], %60 {strides = array<i32>} : memref<1x8x256xf32, #tpu.memory_space<vmem>>, vector<1x8x16xf32>,
    %61 = vector.extract_strided_slice %22 {offsets = [0, 108], sizes = [8, 16], strides = [1, 1]} : vector<8x384xf32> to vector<8x16xf32>
    %c0_43 = arith.constant 0 : index
    %c0_44 = arith.constant 0 : index
    %c96 = arith.constant 96 : index
    %62 = vector.load %arg4[%c0_43, %c0_44, %c96] : memref<1x8x256xf32, #tpu.memory_space<vmem>>, vector<1x8x16xf32>
    %63 = vector.shape_cast %62 : vector<1x8x16xf32> to vector<8x16xf32>
    %64 = vector.shape_cast %61 : vector<8x16xf32> to vector<1x8x16xf32>
    tpu.vector_store %arg4[%c0_43, %c0_44, %c96], %64 {strides = array<i32>} : memref<1x8x256xf32, #tpu.memory_space<vmem>>, vector<1x8x16xf32>,
    %65 = vector.extract_strided_slice %22 {offsets = [0, 126], sizes = [8, 16], strides = [1, 1]} : vector<8x384xf32> to vector<8x16xf32>
    %c0_45 = arith.constant 0 : index
    %c0_46 = arith.constant 0 : index
    %c112 = arith.constant 112 : index
    %66 = vector.load %arg4[%c0_45, %c0_46, %c112] : memref<1x8x256xf32, #tpu.memory_space<vmem>>, vector<1x8x16xf32>
    %67 = vector.shape_cast %66 : vector<1x8x16xf32> to vector<8x16xf32>
    %68 = vector.shape_cast %65 : vector<8x16xf32> to vector<1x8x16xf32>
    tpu.vector_store %arg4[%c0_45, %c0_46, %c112], %68 {strides = array<i32>} : memref<1x8x256xf32, #tpu.memory_space<vmem>>, vector<1x8x16xf32>,
    %69 = vector.extract_strided_slice %22 {offsets = [0, 144], sizes = [8, 16], strides = [1, 1]} : vector<8x384xf32> to vector<8x16xf32>
    %c0_47 = arith.constant 0 : index
    %c0_48 = arith.constant 0 : index
    %c128 = arith.constant 128 : index
    %70 = vector.load %arg4[%c0_47, %c0_48, %c128] : memref<1x8x256xf32, #tpu.memory_space<vmem>>, vector<1x8x16xf32>
    %71 = vector.shape_cast %70 : vector<1x8x16xf32> to vector<8x16xf32>
    %72 = vector.shape_cast %69 : vector<8x16xf32> to vector<1x8x16xf32>
    tpu.vector_store %arg4[%c0_47, %c0_48, %c128], %72 {strides = array<i32>} : memref<1x8x256xf32, #tpu.memory_space<vmem>>, vector<1x8x16xf32>,
    %73 = vector.extract_strided_slice %22 {offsets = [0, 162], sizes = [8, 16], strides = [1, 1]} : vector<8x384xf32> to vector<8x16xf32>
    %c0_49 = arith.constant 0 : index
    %c0_50 = arith.constant 0 : index
    %c144 = arith.constant 144 : index
    %74 = vector.load %arg4[%c0_49, %c0_50, %c144] : memref<1x8x256xf32, #tpu.memory_space<vmem>>, vector<1x8x16xf32>
    %75 = vector.shape_cast %74 : vector<1x8x16xf32> to vector<8x16xf32>
    %76 = vector.shape_cast %73 : vector<8x16xf32> to vector<1x8x16xf32>
    tpu.vector_store %arg4[%c0_49, %c0_50, %c144], %76 {strides = array<i32>} : memref<1x8x256xf32, #tpu.memory_space<vmem>>, vector<1x8x16xf32>,
    %77 = vector.extract_strided_slice %22 {offsets = [0, 180], sizes = [8, 16], strides = [1, 1]} : vector<8x384xf32> to vector<8x16xf32>
    %c0_51 = arith.constant 0 : index
    %c0_52 = arith.constant 0 : index
    %c160 = arith.constant 160 : index
    %78 = vector.load %arg4[%c0_51, %c0_52, %c160] : memref<1x8x256xf32, #tpu.memory_space<vmem>>, vector<1x8x16xf32>
    %79 = vector.shape_cast %78 : vector<1x8x16xf32> to vector<8x16xf32>
    %80 = vector.shape_cast %77 : vector<8x16xf32> to vector<1x8x16xf32>
    tpu.vector_store %arg4[%c0_51, %c0_52, %c160], %80 {strides = array<i32>} : memref<1x8x256xf32, #tpu.memory_space<vmem>>, vector<1x8x16xf32>,
    %81 = vector.extract_strided_slice %22 {offsets = [0, 198], sizes = [8, 16], strides = [1, 1]} : vector<8x384xf32> to vector<8x16xf32>
    %c0_53 = arith.constant 0 : index
    %c0_54 = arith.constant 0 : index
    %c176 = arith.constant 176 : index
    %82 = vector.load %arg4[%c0_53, %c0_54, %c176] : memref<1x8x256xf32, #tpu.memory_space<vmem>>, vector<1x8x16xf32>
    %83 = vector.shape_cast %82 : vector<1x8x16xf32> to vector<8x16xf32>
    %84 = vector.shape_cast %81 : vector<8x16xf32> to vector<1x8x16xf32>
    tpu.vector_store %arg4[%c0_53, %c0_54, %c176], %84 {strides = array<i32>} : memref<1x8x256xf32, #tpu.memory_space<vmem>>, vector<1x8x16xf32>,
    %85 = vector.extract_strided_slice %22 {offsets = [0, 216], sizes = [8, 16], strides = [1, 1]} : vector<8x384xf32> to vector<8x16xf32>
    %c0_55 = arith.constant 0 : index
    %c0_56 = arith.constant 0 : index
    %c192 = arith.constant 192 : index
    %86 = vector.load %arg4[%c0_55, %c0_56, %c192] : memref<1x8x256xf32, #tpu.memory_space<vmem>>, vector<1x8x16xf32>
    %87 = vector.shape_cast %86 : vector<1x8x16xf32> to vector<8x16xf32>
    %88 = vector.shape_cast %85 : vector<8x16xf32> to vector<1x8x16xf32>
    tpu.vector_store %arg4[%c0_55, %c0_56, %c192], %88 {strides = array<i32>} : memref<1x8x256xf32, #tpu.memory_space<vmem>>, vector<1x8x16xf32>,
    %89 = vector.extract_strided_slice %22 {offsets = [0, 234], sizes = [8, 16], strides = [1, 1]} : vector<8x384xf32> to vector<8x16xf32>
    %c0_57 = arith.constant 0 : index
    %c0_58 = arith.constant 0 : index
    %c208 = arith.constant 208 : index
    %90 = vector.load %arg4[%c0_57, %c0_58, %c208] : memref<1x8x256xf32, #tpu.memory_space<vmem>>, vector<1x8x16xf32>
    %91 = vector.shape_cast %90 : vector<1x8x16xf32> to vector<8x16xf32>
    %92 = vector.shape_cast %89 : vector<8x16xf32> to vector<1x8x16xf32>
    tpu.vector_store %arg4[%c0_57, %c0_58, %c208], %92 {strides = array<i32>} : memref<1x8x256xf32, #tpu.memory_space<vmem>>, vector<1x8x16xf32>,
    %93 = vector.extract_strided_slice %22 {offsets = [0, 252], sizes = [8, 16], strides = [1, 1]} : vector<8x384xf32> to vector<8x16xf32>
    %c0_59 = arith.constant 0 : index
    %c0_60 = arith.constant 0 : index
    %c224 = arith.constant 224 : index
    %94 = vector.load %arg4[%c0_59, %c0_60, %c224] : memref<1x8x256xf32, #tpu.memory_space<vmem>>, vector<1x8x16xf32>
    %95 = vector.shape_cast %94 : vector<1x8x16xf32> to vector<8x16xf32>
    %96 = vector.shape_cast %93 : vector<8x16xf32> to vector<1x8x16xf32>
    tpu.vector_store %arg4[%c0_59, %c0_60, %c224], %96 {strides = array<i32>} : memref<1x8x256xf32, #tpu.memory_space<vmem>>, vector<1x8x16xf32>,
    %97 = vector.extract_strided_slice %22 {offsets = [0, 270], sizes = [8, 16], strides = [1, 1]} : vector<8x384xf32> to vector<8x16xf32>
    %c0_61 = arith.constant 0 : index
    %c0_62 = arith.constant 0 : index
    %c240 = arith.constant 240 : index
    %98 = vector.load %arg4[%c0_61, %c0_62, %c240] : memref<1x8x256xf32, #tpu.memory_space<vmem>>, vector<1x8x16xf32>
    %99 = vector.shape_cast %98 : vector<1x8x16xf32> to vector<8x16xf32>
    %100 = vector.shape_cast %97 : vector<8x16xf32> to vector<1x8x16xf32>
    tpu.vector_store %arg4[%c0_61, %c0_62, %c240], %100 {strides = array<i32>} : memref<1x8x256xf32, #tpu.memory_space<vmem>>, vector<1x8x16xf32>,
    return
  }
  func.func @transform_0(%arg0: i32) -> (i32, i32, i32) {
    %c0_i32 = arith.constant 0 : i32
    %c0_i32_0 = arith.constant 0 : i32
    %c0_i32_1 = arith.constant 0 : i32
    return %arg0, %c0_i32, %c0_i32_0 : i32, i32, i32
  }
  func.func @transform_1(%arg0: i32) -> (i32, i32) {
    %c0_i32 = arith.constant 0 : i32
    %c0_i32_0 = arith.constant 0 : i32
    %c0_i32_1 = arith.constant 0 : i32
    return %c0_i32, %c0_i32_0 : i32, i32
  }
  func.func @transform_2(%arg0: i32) -> (i32, i32) {
    %c0_i32 = arith.constant 0 : i32
    %c0_i32_0 = arith.constant 0 : i32
    %c0_i32_1 = arith.constant 0 : i32
    return %c0_i32, %c0_i32_0 : i32, i32
  }
  func.func @transform_3(%arg0: i32) -> (i32, i32, i32) {
    %c0_i32 = arith.constant 0 : i32
    %c0_i32_0 = arith.constant 0 : i32
    %c0_i32_1 = arith.constant 0 : i32
    return %arg0, %c0_i32, %c0_i32_0 : i32, i32, i32
  }
  func.func @transform_4(%arg0: i32) -> (i32, i32, i32) {
    %c0_i32 = arith.constant 0 : i32
    %c0_i32_0 = arith.constant 0 : i32
    %c0_i32_1 = arith.constant 0 : i32
    return %arg0, %c0_i32, %c0_i32_0 : i32, i32, i32
  }
  func.func @transform_5(%arg0: i32) -> (i32, i32, i32) {
    %c0_i32 = arith.constant 0 : i32
    %c0_i32_0 = arith.constant 0 : i32
    %c0_i32_1 = arith.constant 0 : i32
    return %arg0, %c0_i32, %c0_i32_0 : i32, i32, i32
  }
}

module attributes {stable_mosaic.version = 11 : i64} {
  func.func @_bn_relu_kernel(%arg0: i32, %arg1: memref<1x8x256xf32, #tpu.memory_space<vmem>>, %arg2: memref<8x1xf32, #tpu.memory_space<vmem>>, %arg3: memref<8x1xf32, #tpu.memory_space<vmem>>, %arg4: memref<1x8x256xf32, #tpu.memory_space<vmem>>) attributes {dimension_semantics = [#tpu.dimension_semantics<parallel>], iteration_bounds = array<i64: 2>, scalar_prefetch = 0 : i64, scratch_operands = 0 : i64, tpu.core_type = #tpu.core_type<tc>, window_params = [{transform_indices = @transform_0, window_bounds = array<i64: 1, 8, 256>}, {pipeline_mode = #tpu.pipeline_mode<synchronous>, transform_indices = @transform_1, window_bounds = array<i64: 8, 1>}, {pipeline_mode = #tpu.pipeline_mode<synchronous>, transform_indices = @transform_2, window_bounds = array<i64: 8, 1>}, {transform_indices = @transform_3, window_bounds = array<i64: 1, 8, 256>}]} {
    %c0 = arith.constant 0 : index
    %c0_0 = arith.constant 0 : index
    %c0_1 = arith.constant 0 : index
    %0 = vector.load %arg1[%c0, %c0_0, %c0_1] : memref<1x8x256xf32, #tpu.memory_space<vmem>>, vector<1x8x256xf32>
    %1 = vector.shape_cast %0 : vector<1x8x256xf32> to vector<8x256xf32>
    %c0_2 = arith.constant 0 : index
    %c0_3 = arith.constant 0 : index
    %2 = vector.load %arg2[%c0_2, %c0_3] : memref<8x1xf32, #tpu.memory_space<vmem>>, vector<8x1xf32>
    %3 = vector.broadcast %2 : vector<8x1xf32> to vector<8x256xf32>
    %4 = arith.mulf %1, %3 : vector<8x256xf32>
    %c0_4 = arith.constant 0 : index
    %c0_5 = arith.constant 0 : index
    %5 = vector.load %arg3[%c0_4, %c0_5] : memref<8x1xf32, #tpu.memory_space<vmem>>, vector<8x1xf32>
    %6 = vector.broadcast %5 : vector<8x1xf32> to vector<8x256xf32>
    %7 = arith.addf %4, %6 : vector<8x256xf32>
    %cst = arith.constant 0.000000e+00 : f32
    %8 = vector.broadcast %cst : f32 to vector<8x256xf32>
    %9 = arith.maximumf %7, %8 : vector<8x256xf32>
    %c0_6 = arith.constant 0 : index
    %c0_7 = arith.constant 0 : index
    %c0_8 = arith.constant 0 : index
    %10 = vector.load %arg4[%c0_6, %c0_7, %c0_8] : memref<1x8x256xf32, #tpu.memory_space<vmem>>, vector<1x8x256xf32>
    %11 = vector.shape_cast %10 : vector<1x8x256xf32> to vector<8x256xf32>
    %12 = vector.shape_cast %9 : vector<8x256xf32> to vector<1x8x256xf32>
    tpu.vector_store %arg4[%c0_6, %c0_7, %c0_8], %12 {strides = array<i32>} : memref<1x8x256xf32, #tpu.memory_space<vmem>>, vector<1x8x256xf32>,
    return
  }
  func.func @transform_0(%arg0: i32) -> (i32, i32, i32) {
    %c0_i32 = arith.constant 0 : i32
    %c0_i32_0 = arith.constant 0 : i32
    %c0_i32_1 = arith.constant 0 : i32
    return %arg0, %c0_i32, %c0_i32_0 : i32, i32, i32
  }
  func.func @transform_1(%arg0: i32) -> (i32, i32) {
    %c0_i32 = arith.constant 0 : i32
    %c0_i32_0 = arith.constant 0 : i32
    %c0_i32_1 = arith.constant 0 : i32
    return %c0_i32, %c0_i32_0 : i32, i32
  }
  func.func @transform_2(%arg0: i32) -> (i32, i32) {
    %c0_i32 = arith.constant 0 : i32
    %c0_i32_0 = arith.constant 0 : i32
    %c0_i32_1 = arith.constant 0 : i32
    return %c0_i32, %c0_i32_0 : i32, i32
  }
  func.func @transform_3(%arg0: i32) -> (i32, i32, i32) {
    %c0_i32 = arith.constant 0 : i32
    %c0_i32_0 = arith.constant 0 : i32
    %c0_i32_1 = arith.constant 0 : i32
    return %arg0, %c0_i32, %c0_i32_0 : i32, i32, i32
  }
}

</mosaic_0001>

<bundles_post_ra>
// kernel: conv2d_bn_relu.3
= control target key start
LH: loop header
LB: loop body
LE: loop exit
PB: predicated region body
PF: predicated region fallthrough
CT: control target
= control target key end

     0   :  { %s300_s12 = smov 0   ;;  %s323_s0 = inlined_call_operand.vmem [shape: f32[2,8,256], index: 0, kind: input, shape index: {}]   ;;  %s324_s1 = inlined_call_operand.vmem [shape: f32[8,1], index: 1, kind: input, shape index: {}]   ;;  %s325_s2 = inlined_call_operand.vmem [shape: f32[8,1], index: 2, kind: input, shape index: {}]   ;;  %s326_s3 = inlined_call_operand.vmem [shape: f32[2,8,256], index: 3, kind: output, shape index: {}]  }
   0x1 LB: > { %s248_s13 = sadd.s32 4294967295, %s277_s12   ;;  %p252_p0 = scmp.ge.s32.totalorder %s277_s12, 1  ;;  %s277_s12 = sphi %s300_s12, %s13_s12  }
   0x2   : > { %p137_p1 = scmp.lt.s32.totalorder %s277_s12, 3 }
   0x4   : > { %p138_p2 = pnand %p252_p0, %p137_p1 }
   0x5   : > { %p161_p3 = scmp.lt.s32.totalorder (!%p138_p2), %s248_s13, 1 }
   0x6   : > { %141 = sbr.rel (%p138_p2) target bundleno = 146 (0x92), region = 32 }
   0xb   : > { %v173_v0 = vld [vmem:[%s324_s1] sm:$0xff]  ;;  %v279_v1 = vmov 0   ;;  %s328_s13 = smov (!%p161_p3, %s248_s13), 1 }
   0xc   : > { %270 = vset.pattern.permute.xlu0 %v279_v1  ;;  %v181_v2 = vld [vmem:[%s325_s2] sm:$0xff]  ;;  %s259_s18 = sshll.u32 %s328_s13, 4 }
   0xd   : > { %176 = vperm.xlu0 %270, %v173_v0   ;;  %s165_s21 = scalar_lea.vmem %s323_s0, %s259_s18  ;;  %s170_s24 = scalar_lea.vmem %s326_s3, %s259_s18 }
   0xe   : > { %v171_v4 = vld [vmem:[%s165_s21] sm:$0xff]  ;;  %v172_v5 = vld [vmem:[%s165_s21 + $0x8] sm:$0xff] }
  0x11   : > { %184 = vperm.xlu0 %270, %v181_v2  }
  0x88   : > { %v177_v3 = vpop.permute.xlu0 %176 }
  0x89   : > { %v179_v6 = vmul.f32 %v177_v3, %v171_v4  ;;  %v180_v7 = vmul.f32 %v177_v3, %v172_v5 }
  0x8c   : > { %v185_v8 = vpop.permute.xlu0 %184 }
  0x8d   : > { %v187_v9 = vadd.f32 %v185_v8, %v179_v6  ;;  %v188_v10 = vadd.f32 %v185_v8, %v180_v7 }
  0x8f   : > { %v189_v11 = vmax.f32 %v187_v9, 0.0  ;;  %v190_v12 = vmax.f32 %v188_v10, 0.0 }
  0x91   : > { %191 = vst [vmem:[%s170_s24] sm:$0xff] %v189_v11  ;;  %192 = vst [vmem:[%s170_s24 + $0x8] sm:$0xff] %v190_v12 }
  0x92 PF: > { %s13_s12 = sadd.s32 1, %s277_s12  }
  0x93   : > { %p10_p4 = scmp.ge.s32.totalorder %s13_s12, 4  }
  0x95   :  { %12 = sbr.rel (!%p10_p4) target bundleno = 1 (0x1), region = 62 }

// kernel: conv2d_bn_relu.2
= control target key start
LH: loop header
LB: loop body
LE: loop exit
PB: predicated region body
PF: predicated region fallthrough
CT: control target
= control target key end

     0   :  { %s943_s18 = smov 0   ;;  %s1092_s0 = inlined_call_operand.vmem [shape: f32[2,8,432], index: 0, kind: input, shape index: {}]   ;;  %s1093_s1 = inlined_call_operand.vmem [shape: f32[8,72], index: 1, kind: input, shape index: {}]   ;;  %s1094_s2 = inlined_call_operand.vmem [shape: f32[1,384], index: 2, kind: input, shape index: {}]   ;;  %s1095_s3 = inlined_call_operand.vmem [shape: f32[2,8,256], index: 3, kind: output, shape index: {0}]   ;;  %s1096_s4 = inlined_call_operand.vmem [shape: f32[2,8,1], index: 4, kind: output, shape index: {1}]   ;;  %s1097_s5 = inlined_call_operand.vmem [shape: f32[2,8,1], index: 5, kind: output, shape index: {2}]  }
   0x1 LB: > { %s805_s19 = sadd.s32 4294967295, %s889_s18   ;;  %p809_p0 = scmp.ge.s32.totalorder %s889_s18, 1  ;;  %s889_s18 = sphi %s943_s18, %s16_s18  }
   0x2   : > { %p192_p1 = scmp.lt.s32.totalorder %s889_s18, 3 }
   0x4   : > { %p193_p2 = pnand %p809_p0, %p192_p1 }
   0x5   : > { %p228_p3 = scmp.lt.s32.totalorder (!%p193_p2), %s805_s19, 1  ;;  %s891_s24 = smov (!%p193_p2), 90  }
   0x6   : > { %196 = sbr.rel (%p193_p2) target bundleno = 591 (0x24f), region = 32  ;;  %s893_s25 = smov (!%p193_p2), 91  }
   0x7   : > { %s894_s26 = smov (!%p193_p2), 92   ;;  %s895_s27 = smov (!%p193_p2), 108  }
   0x8   : > { %s896_s28 = smov (!%p193_p2), 109   ;;  %s897_s29 = smov (!%p193_p2), 110  }
   0x9   : > { %s898_s30 = smov (!%p193_p2), 126   ;;  %s899_s6 = smov (!%p193_p2), 127  }
   0xa   : > { %s901_s13 = smov (!%p193_p2), 124   ;;  %s902_s14 = smov (!%p193_p2), 100  }
   0xb   : > { %s1099_s19 = smov (!%p228_p3, %s805_s19), 1  ;;  %v892_v3 = vmov 0.0   ;;  %vm900_vm0 = vmmov 0   ;;  %vm391_vm1 = vcmask 736256   ;;  %vm373_vm2 = vcmask 744448   ;;  %v401_v57 = vld [vmem:[%s1093_s1] sm:$0xff] }
   0xc   : > { %s820_s20 = sshll.u32 %s1099_s19, 5  ;;  %832 = vmatprep.subr.mxu1 %v892_v3  ;;  %497 = vmatprep.mubr.f32.mxu0 %v892_v3  ;;  %vm355_vm3 = vcmask 752640   ;;  %vm337_vm4 = vcmask 883712   ;;  %vm319_vm5 = vcmask 891904   ;;  %vm301_vm6 = vcmask 900096   ;;  %s821_s9 = sshll.u32 %s1099_s19, 4 }
   0xd   : > { %s232_s23 = scalar_lea.vmem %s1092_s0, %s820_s20  ;;  %850 = vmatprep.mubr.msk.f32.mxu1 %vm900_vm0, %v892_v3  ;;  %vm283_vm7 = vcmask 1031168   ;;  %vm265_vm8 = vcmask 1039360   ;;  %vm429_vm9 = vcmask 588800   ;;  %s1044_s12 = scalar_lea.vmem %s1095_s3, %s821_s9  ;;  %vm608_vm10 = vcmask 130048  }
   0xe   : > { %v957_v0 = vld [vmem:[%s232_s23 + $0x8] sm:$0xff]  ;;  %v959_v1 = vld [vmem:[%s232_s23] sm:$0xff]  ;;  %v963_v2 = vld [vmem:[%s232_s23 + $0x10] sm:$0xff]  ;;  %s903_s15 = smov 122   ;;  %s904_s16 = smov 114   ;;  %vm614_vm11 = vcmask 261248  }
   0xf   : > { %385 = vrot.lane.b32.xlu0 %v957_v0, %s891_s24  ;;  %383 = vrot.lane.b32.xlu1 %v959_v1, %s891_s24  ;;  %v249_v4 = vld [vmem:[%s232_s23 + $0x18] sm:$0xff]  ;;  %s905_s17 = smov 120   ;;  %s906_s20 = smov 112   ;;  %vm619_vm12 = vcmask 392448   ;;  %vm624_vm13 = vcmask 523648   ;;  %vm629_vm14 = vcmask 654848  }
  0x10   : > { %s907_s21 = smov 118   ;;  %s908_s22 = smov 116   ;;  %vm634_vm15 = vcmask 786048   ;;  %vm639_vm0 = vcmask 917248  }
  0x11   : > { %s909_s23 = smov 106  }
  0x13   : > { %387 = vrot.lane.b32.xlu0 %v963_v2, %s891_s24  ;;  %367 = vrot.lane.b32.xlu1 %v957_v0, %s893_s25 }
  0x17   : > { %369 = vrot.lane.b32.xlu0 %v963_v2, %s893_s25  ;;  %365 = vrot.lane.b32.xlu1 %v959_v1, %s893_s25 }
  0x1b   : > { %349 = vrot.lane.b32.xlu0 %v957_v0, %s894_s26  ;;  %351 = vrot.lane.b32.xlu1 %v963_v2, %s894_s26 }
  0x1f   : > { %347 = vrot.lane.b32.xlu0 %v959_v1, %s894_s26  ;;  %389 = vrot.lane.b32.xlu1 %v249_v4, %s891_s24  ;;  %s910_s24 = smov 104  }
  0x23   : > { %331 = vrot.lane.b32.xlu0 %v957_v0, %s895_s27  ;;  %333 = vrot.lane.b32.xlu1 %v963_v2, %s895_s27 }
  0x27   : > { %329 = vrot.lane.b32.xlu0 %v959_v1, %s895_s27  ;;  %371 = vrot.lane.b32.xlu1 %v249_v4, %s893_s25  ;;  %s911_s25 = smov 102  }
  0x2b   : > { %313 = vrot.lane.b32.xlu0 %v957_v0, %s896_s28  ;;  %315 = vrot.lane.b32.xlu1 %v963_v2, %s896_s28 }
  0x2f   : > { %311 = vrot.lane.b32.xlu0 %v959_v1, %s896_s28  ;;  %353 = vrot.lane.b32.xlu1 %v249_v4, %s894_s26 }
  0x33   : > { %295 = vrot.lane.b32.xlu0 %v957_v0, %s897_s29  ;;  %297 = vrot.lane.b32.xlu1 %v963_v2, %s897_s29 }
  0x37   : > { %293 = vrot.lane.b32.xlu0 %v959_v1, %s897_s29  ;;  %335 = vrot.lane.b32.xlu1 %v249_v4, %s895_s27 }
  0x3b   : > { %277 = vrot.lane.b32.xlu0 %v957_v0, %s898_s30  ;;  %279 = vrot.lane.b32.xlu1 %v963_v2, %s898_s30 }
  0x3f   : > { %275 = vrot.lane.b32.xlu0 %v959_v1, %s898_s30  ;;  %317 = vrot.lane.b32.xlu1 %v249_v4, %s896_s28 }
  0x43   : > { %259 = vrot.lane.b32.xlu0 %v957_v0, %s899_s6  ;;  %261 = vrot.lane.b32.xlu1 %v963_v2, %s899_s6 }
  0x47   : > { %257 = vrot.lane.b32.xlu0 %v959_v1, %s899_s6  ;;  %299 = vrot.lane.b32.xlu1 %v249_v4, %s897_s29 }
  0x4b   : > { %281 = vrot.lane.b32.xlu0 %v249_v4, %s898_s30  ;;  %263 = vrot.lane.b32.xlu1 %v249_v4, %s899_s6 }
  0x81   : > { %v386_v5 = vpop.permute.xlu0 %385  ;;  %v384_v6 = vpop.permute.xlu1 %383 }
  0x82   : > { %v392_v10 = vsel %vm391_vm1, %v384_v6, %v386_v5  ;;  %v574_v6 = vld [vmem:[%s1094_s2] sm:$0x7] }
  0x85   : > { %v388_v7 = vpop.permute.xlu0 %387  ;;  %v368_v8 = vpop.permute.xlu1 %367 }
  0x86   : > { %v393_v9 = vsel %vm391_vm1, %v386_v5, %v388_v7 }
  0x87   : > { %447 = vmatprep.subr.mxu0 %v393_v9 }
  0x88   : > { %448 = vmatpush1.msra.mxu0 %v392_v10 }
  0x89   : > { %v370_v11 = vpop.permute.xlu0 %369  ;;  %v366_v12 = vpop.permute.xlu1 %365 }
  0x8a   : > { %v375_v13 = vsel %vm373_vm2, %v368_v8, %v370_v11  ;;  %v374_v14 = vsel %vm373_vm2, %v366_v12, %v368_v8 }
  0x8b   : > { %449 = vmatprep.subr.mxu0 %v375_v13 }
  0x8c   : > { %450 = vmatpush1.msra.mxu0 %v374_v14 }
  0x8d   : > { %v350_v15 = vpop.permute.xlu0 %349  ;;  %v352_v16 = vpop.permute.xlu1 %351 }
  0x8e   : > { %v357_v17 = vsel %vm355_vm3, %v350_v15, %v352_v16 }
  0x8f   : > { %451 = vmatprep.subr.mxu0 %v357_v17 }
  0x91   : > { %v348_v18 = vpop.permute.xlu0 %347  ;;  %v390_v19 = vpop.permute.xlu1 %389 }
  0x92   : > { %v356_v20 = vsel %vm355_vm3, %v348_v18, %v350_v15  ;;  %v394_v21 = vsel %vm391_vm1, %v388_v7, %v390_v19  ;;  %vm680_vm1 = vcmask 818176  }
  0x93   : > { %452 = vmatpush1.msra.mxu0 %v356_v20  ;;  %833 = vmatpush3.msra.mxu1 %v394_v21 }
  0x94   : > { %834 = vmatprep.subr.mxu1 %v892_v3 }
  0x95   : > { %v332_v22 = vpop.permute.xlu0 %331  ;;  %v334_v23 = vpop.permute.xlu1 %333 }
  0x96   : > { %v339_v24 = vsel %vm337_vm4, %v332_v22, %v334_v23 }
  0x97   : > { %453 = vmatprep.subr.mxu0 %v339_v24 }
  0x99   : > { %v330_v25 = vpop.permute.xlu0 %329  ;;  %v372_v26 = vpop.permute.xlu1 %371 }
  0x9a   : > { %v338_v27 = vsel %vm337_vm4, %v330_v25, %v332_v22  ;;  %v376_v28 = vsel %vm373_vm2, %v370_v11, %v372_v26  ;;  %vm598_vm2 = vcmask 7168  }
  0x9b   : > { %454 = vmatpush1.msra.mxu0 %v338_v27  ;;  %835 = vmatpush3.msra.mxu1 %v376_v28 }
  0x9c   : > { %836 = vmatprep.subr.mxu1 %v892_v3 }
  0x9d   : > { %v314_v29 = vpop.permute.xlu0 %313  ;;  %v316_v30 = vpop.permute.xlu1 %315 }
  0x9e   : > { %v321_v31 = vsel %vm319_vm5, %v314_v29, %v316_v30 }
  0x9f   : > { %455 = vmatprep.subr.mxu0 %v321_v31 }
  0xa1   : > { %v312_v32 = vpop.permute.xlu0 %311  ;;  %v354_v33 = vpop.permute.xlu1 %353 }
  0xa2   : > { %v320_v34 = vsel %vm319_vm5, %v312_v32, %v314_v29  ;;  %v358_v35 = vsel %vm355_vm3, %v352_v16, %v354_v33  ;;  %vm646_vm3 = vcmask 932864  }
  0xa3   : > { %456 = vmatpush1.msra.mxu0 %v320_v34  ;;  %837 = vmatpush3.msra.mxu1 %v358_v35 }
  0xa4   : > { %838 = vmatprep.subr.mxu1 %v892_v3 }
  0xa5   : > { %v296_v36 = vpop.permute.xlu0 %295  ;;  %v298_v37 = vpop.permute.xlu1 %297 }
  0xa6   : > { %v303_v38 = vsel %vm301_vm6, %v296_v36, %v298_v37 }
  0xa7   : > { %457 = vmatprep.subr.mxu0 %v303_v38 }
  0xa9   : > { %v294_v39 = vpop.permute.xlu0 %293  ;;  %v336_v40 = vpop.permute.xlu1 %335 }
  0xaa   : > { %v302_v41 = vsel %vm301_vm6, %v294_v39, %v296_v36  ;;  %v340_v42 = vsel %vm337_vm4, %v334_v23, %v336_v40  ;;  %vm649_vm4 = vcmask 1048448  }
  0xab   : > { %458 = vmatpush1.msra.mxu0 %v302_v41  ;;  %839 = vmatpush3.msra.mxu1 %v340_v42 }
  0xac   : > { %840 = vmatprep.subr.mxu1 %v892_v3 }
  0xad   : > { %v278_v43 = vpop.permute.xlu0 %277  ;;  %v280_v44 = vpop.permute.xlu1 %279 }
  0xae   : > { %v285_v45 = vsel %vm283_vm7, %v278_v43, %v280_v44 }
  0xaf   : > { %459 = vmatprep.subr.mxu0 %v285_v45 }
  0xb1   : > { %v276_v46 = vpop.permute.xlu0 %275  ;;  %v318_v47 = vpop.permute.xlu1 %317 }
  0xb2   : > { %v284_v48 = vsel %vm283_vm7, %v276_v46, %v278_v43  ;;  %v322_v49 = vsel %vm319_vm5, %v316_v30, %v318_v47 }
  0xb3   : > { %460 = vmatpush1.msra.mxu0 %v284_v48  ;;  %841 = vmatpush3.msra.mxu1 %v322_v49 }
  0xb4   : > { %842 = vmatprep.subr.mxu1 %v892_v3 }
  0xb5   : > { %v260_v50 = vpop.permute.xlu0 %259  ;;  %v262_v51 = vpop.permute.xlu1 %261 }
  0xb6   : > { %v267_v52 = vsel %vm265_vm8, %v260_v50, %v262_v51 }
  0xb7   : > { %461 = vmatprep.subr.mxu0 %v267_v52 }
  0xb9   : > { %v258_v53 = vpop.permute.xlu0 %257  ;;  %v300_v54 = vpop.permute.xlu1 %299 }
  0xba   : > { %v266_v55 = vsel %vm265_vm8, %v258_v53, %v260_v50  ;;  %v304_v56 = vsel %vm301_vm6, %v298_v37, %v300_v54 }
  0xbb   : > { %462 = vmatpush1.msra.mxu0 %v266_v55  ;;  %843 = vmatpush3.msra.mxu1 %v304_v56 }
  0xbc   : > { %463 = vmatprep.subr.mxu0 %v957_v0  ;;  %844 = vmatprep.subr.mxu1 %v892_v3 }
  0xbd   : > { %v282_v58 = vpop.permute.xlu0 %281  ;;  %464 = vmatpush1.msra.mxu0 %v959_v1  ;;  %v264_v59 = vpop.permute.xlu1 %263 }
  0xbe   : > { %816 = vmatmul.mubr.msk.f32.vlgmr.msra.gmra.mxu0 %vm429_vm9, %v401_v57  ;;  %v286_v60 = vsel %vm283_vm7, %v280_v44, %v282_v58  ;;  %v268_v61 = vsel %vm265_vm8, %v262_v51, %v264_v59 }
  0xbf   : > { %845 = vmatpush3.msra.mxu1 %v286_v60 }
  0xc0   : > { %846 = vmatprep.subr.mxu1 %v892_v3 }
  0xc1   : > { %847 = vmatpush3.msra.mxu1 %v268_v61 }
  0xc2   : > { %848 = vmatprep.subr.mxu1 %v892_v3 }
  0xc3   : > { %849 = vmatpush3.msra.mxu1 %v963_v2  ;;  %v576_v2 = vlaneseq }
  0xc4   : > { %851 = vmatmul.mubr.msk.f32.vlgmr.msra.gmra.mxu1 %vm429_vm9, %v401_v57 }
  0xc5   : > { %v577_v3 = vshrl.u32 %v576_v2, 7 }
  0xc7   : > { %v578_v4 = vsub.s32 0, %v577_v3  ;;  %v582_v5 = vsub.s32 1, %v577_v3  ;;  %v586_v7 = vsub.s32 2, %v577_v3 }
  0xc9   : > { %v579_v8 = vrot.slane %v574_v6, %v578_v4  ;;  %v583_v9 = vrot.slane %v574_v6, %v582_v5  ;;  %v587_v10 = vrot.slane %v574_v6, %v586_v7 }
 0x17e   : > { %v499_v62 = vpop.f32.mrf.mxu0 }
 0x17f   : > { %611 = vrot.lane.b32.xlu1 %v499_v62, %s898_s30  ;;  %609 = vst.msk [vmem:[%s1044_s12] sm:$0xff] %vm608_vm10, %v499_v62  ;;  %v591_v11 = vmul.f32 %v579_v8, %v499_v62 }
 0x180   : > { %v501_v1 = vpop.f32.mrf.mxu0 }
 0x181   : > { %v592_v12 = vmul.f32 %v583_v9, %v501_v1  ;;  %v600_v14 = vmul.f32 %v591_v11, %v499_v62 }
 0x183   : > { %616 = vrot.lane.b32.xlu1 %v499_v62, %s901_s13  ;;  %v601_v15 = vmul.f32 %v592_v12, %v501_v1  ;;  %v594_v19 = vadd.f32 %v592_v12, %v591_v11 }
 0x184   : > { %v570_v63 = vpop.f32.mrf.mxu1 }
 0x185   : > { %678 = vrot.lane.b32.xlu0 %v570_v63, %s902_s14  ;;  %v593_v13 = vmul.f32 %v587_v10, %v570_v63  ;;  %v603_v17 = vadd.f32 %v601_v15, %v600_v14 }
 0x186   : > { %v852_v0 = vpop.f32.mrf.mxu1 }
 0x187   : > { %621 = vrot.lane.b32.xlu1 %v499_v62, %s903_s15  ;;  %v602_v16 = vmul.f32 %v593_v13, %v570_v63  ;;  %v595_v20 = vadd.f32 %v594_v19, %v593_v13 }
 0x189   : > { %642 = vrot.lane.b32.xlu0 %v499_v62, %s904_s16  ;;  %v604_v18 = vadd.f32 %v603_v17, %v602_v16 }
 0x18b   : > { %626 = vrot.lane.b32.xlu1 %v499_v62, %s905_s17 }
 0x18d   : > { %651 = vrot.lane.b32.xlu0 %v501_v1, %s906_s20 }
 0x18f   : > { %631 = vrot.lane.b32.xlu1 %v499_v62, %s907_s21 }
 0x191   : > { %655 = vrot.lane.b32.xlu0 %v501_v1, %s897_s29  ;;  %s814_s29 = sshll.u32 %s1099_s19, 3 }
 0x192   : > { %s245_s7 = scalar_lea.vmem %s1097_s5, %s814_s29  ;;  %s241_s10 = scalar_lea.vmem %s1096_s4, %s814_s29 }
 0x193   : > { %636 = vrot.lane.b32.xlu1 %v499_v62, %s908_s22 }
 0x195   : > { %659 = vrot.lane.b32.xlu0 %v501_v1, %s895_s27  ;;  %s912_s27 = smov 98  }
 0x197   : > { %676 = vrot.lane.b32.xlu1 %v501_v1, %s902_s14 }
 0x199   : > { %663 = vrot.lane.b32.xlu0 %v501_v1, %s909_s23 }
 0x19d   : > { %667 = vrot.lane.b32.xlu0 %v501_v1, %s910_s24 }
 0x1a1   : > { %671 = vrot.lane.b32.xlu0 %v501_v1, %s911_s25 }
 0x1bb   : > { %605 = vadd.xlane.f32.xlu1 %v604_v18 }
 0x1c0   : > { %596 = vadd.xlane.f32.xlu0 %v595_v20 }
 0x1cc   : > { %644 = vrot.lane.b32.xlu1 %v501_v1, %s904_s16 }
 0x1d6   : > { %684 = vrot.lane.b32.xlu0 %v570_v63, %s912_s27 }
 0x1f1   : > { %v612_v21 = vpop.permute.xlu1 %611 }
 0x1f2   : > { %615 = vst.msk [vmem:[%s1044_s12] sm:$0xff] %vm614_vm11, %v612_v21 }
 0x1f5   : > { %v617_v22 = vpop.permute.xlu1 %616 }
 0x1f6   : > { %620 = vst.msk [vmem:[%s1044_s12] sm:$0xff] %vm619_vm12, %v617_v22 }
 0x1f7   : > { %v679_v23 = vpop.permute.xlu0 %678 }
 0x1f9   : > { %v622_v24 = vpop.permute.xlu1 %621 }
 0x1fa   : > { %625 = vst.msk [vmem:[%s1044_s12] sm:$0xff] %vm624_vm13, %v622_v24 }
 0x1fb   : > { %v643_v25 = vpop.permute.xlu0 %642 }
 0x1fd   : > { %v627_v26 = vpop.permute.xlu1 %626 }
 0x1fe   : > { %630 = vst.msk [vmem:[%s1044_s12] sm:$0xff] %vm629_vm14, %v627_v26 }
 0x1ff   : > { %v652_v27 = vpop.permute.xlu0 %651 }
 0x200   : > { %654 = vst.msk [vmem:[%s1044_s12 + $0x8] sm:$0xff] %vm608_vm10, %v652_v27 }
 0x201   : > { %v632_v28 = vpop.permute.xlu1 %631 }
 0x202   : > { %635 = vst.msk [vmem:[%s1044_s12] sm:$0xff] %vm634_vm15, %v632_v28 }
 0x203   : > { %v656_v29 = vpop.permute.xlu0 %655 }
 0x204   : > { %658 = vst.msk [vmem:[%s1044_s12 + $0x8] sm:$0xff] %vm614_vm11, %v656_v29 }
 0x205   : > { %v637_v30 = vpop.permute.xlu1 %636 }
 0x206   : > { %640 = vst.msk [vmem:[%s1044_s12] sm:$0xff] %vm639_vm0, %v637_v30 }
 0x207   : > { %v660_v31 = vpop.permute.xlu0 %659 }
 0x208   : > { %662 = vst.msk [vmem:[%s1044_s12 + $0x8] sm:$0xff] %vm619_vm12, %v660_v31 }
 0x209   : > { %v677_v34 = vpop.permute.xlu1 %676 }
 0x20a   : > { %v681_v36 = vsel %vm680_vm1, %v677_v34, %v679_v23 }
 0x20b   : > { %v664_v32 = vpop.permute.xlu0 %663 }
 0x20c   : > { %666 = vst.msk [vmem:[%s1044_s12 + $0x8] sm:$0xff] %vm624_vm13, %v664_v32 }
 0x20f   : > { %v668_v33 = vpop.permute.xlu0 %667 }
 0x210   : > { %670 = vst.msk [vmem:[%s1044_s12 + $0x8] sm:$0xff] %vm629_vm14, %v668_v33 }
 0x213   : > { %v672_v35 = vpop.permute.xlu0 %671 }
 0x214   : > { %674 = vst.msk [vmem:[%s1044_s12 + $0x8] sm:$0xff] %vm634_vm15, %v672_v35 }
 0x215   : > { %683 = vst.msk [vmem:[%s1044_s12 + $0x8] sm:$0xff] %vm639_vm0, %v681_v36 }
 0x244   : > { %v606_v37 = vpop.xlane.xlu1 %605 }
 0x245   : > { %607 = vst.msk [vmem:[%s245_s7] sm:$0xff] %vm598_vm2, %v606_v37 }
 0x248   : > { %v645_v38 = vpop.permute.xlu1 %644 }
 0x249   : > { %v647_v39 = vsel %vm646_vm3, %v643_v25, %v645_v38  ;;  %v597_v40 = vpop.xlane.xlu0 %596 }
 0x24a   : > { %650 = vst.msk [vmem:[%s1044_s12] sm:$0xff] %vm649_vm4, %v647_v39 }
 0x24b   : > { %599 = vst.msk [vmem:[%s241_s10] sm:$0xff] %vm598_vm2, %v597_v40 }
 0x24d   : > { %v685_v41 = vpop.permute.xlu0 %684 }
 0x24e   : > { %687 = vst.msk [vmem:[%s1044_s12 + $0x8] sm:$0xff] %vm649_vm4, %v685_v41 }
 0x24f PF: > { %s16_s18 = sadd.s32 1, %s889_s18  }
 0x250   : > { %p13_p4 = scmp.ge.s32.totalorder %s16_s18, 4  }
 0x252   :  { %15 = sbr.rel (!%p13_p4) target bundleno = 1 (0x1), region = 86 }

</bundles_post_ra>
